<compile_context>
chip_gen: v7x
topology: tpu7x:2x2x1
jax: 0.10.0
libtpu: 0.0.40
codegen_flags: <defaults>
</compile_context>

<pallas_src>
import functools

import jax
import jax.numpy as jnp
from jax.experimental import pallas as pl
from jax.experimental.pallas import tpu as pltpu


_VMEM_WORKING_SET_BUDGET = 32 * 1024 * 1024   # bytes for the per-step working set
_VMEM_LIMIT_FLOOR = 32 * 1024 * 1024          # raise v5e's 16 MiB default
_VMEM_LIMIT_CAP = 48 * 1024 * 1024            # headroom under v7x's 64 MiB physical


def _kldiv_partial_kernel(logits_ref, exp_t_ref, wsum_out_ref, lse_out_ref, *,
                          batch_size):
    """Per-tile partials: sum_b [sum_c exp(t_c)*x_bc] and sum_b lse_b."""
    i = pl.program_id(0)
    tile_rows = logits_ref.shape[0]

    # exp/lse and accumulations stay in f32 for precision (bf16 in is widened).
    x = logits_ref[...].astype(jnp.float32)       # (TB, C) logits tile
    exp_t = exp_t_ref[...]                        # (1, C) f32, VMEM-resident

    # Numerically stable row-wise logsumexp along the class (lane) axis.
    m = jnp.max(x, axis=1, keepdims=True)                                 # (TB, 1)
    lse = jnp.log(jnp.sum(jnp.exp(x - m), axis=1, keepdims=True)) + m    # (TB, 1)

    # Row-wise weighted logit sum: sum_c exp(t_c) * x[b, c].
    wsum = jnp.sum(x * exp_t, axis=1, keepdims=True)                     # (TB, 1)

    # Only the last tile can be ragged; masking at the (TB, 1) row level is
    # O(TB) (vs. O(TB*C) main work) so it is left unconditional instead of
    # being gated behind pl.when.  jnp.where also scrubs any NaN/Inf coming
    # from Pallas-padded rows of the final partial block.
    row_ids = (
        jax.lax.broadcasted_iota(jnp.int32, (tile_rows, 1), 0) + i * tile_rows
    )
    valid = row_ids < batch_size                                          # (TB, 1)
    wsum_partial = jnp.sum(jnp.where(valid, wsum, 0.0))
    lse_partial = jnp.sum(jnp.where(valid, lse, 0.0))

    # Lane-dense scalar writes: replicate each partial across an (8,128) block.
    wsum_out_ref[...] = jnp.full((1, 8, 128), wsum_partial, dtype=jnp.float32)
    lse_out_ref[...] = jnp.full((1, 8, 128), lse_partial, dtype=jnp.float32)


def _choose_tile_rows(num_classes, in_itemsize):
    # Per grid step the working set is roughly:
    #   2 x (TB, C) input buffers at the input itemsize (double-buffered DMA)
    #   ~3 x (TB, C) f32 temporaries (widened x, x*exp_t, exp(x - m))
    # Budget TB from that f32-aware total so bf16 inputs don't overshoot VMEM.
    bytes_per_row = num_classes * (2 * in_itemsize + 3 * 4)
    tb = _VMEM_WORKING_SET_BUDGET // max(1, bytes_per_row)
    tb = max(8, (tb // 8) * 8)
    return min(tb, 8192)


def kldiv_loss(results, targets, *, tile_rows=None):
    """results: (B, C) pre-softmax logits (f32 or bf16).
    targets: (C,) or (1, C) log-probabilities (broadcast over the batch, per
             the module docstring).
    """
    B, C = results.shape
    t = jnp.asarray(targets, jnp.float32).reshape(-1)
    if t.shape[0] != C:
        raise ValueError(
            "targets must have shape (num_classes,) per the module docstring")
    t = t.reshape(1, C)

    # Target-only math hoisted out of the per-row kernel work.
    exp_t = jnp.exp(t)                      # (1, C)
    const_term = jnp.sum(exp_t * t)         # sum_c exp(t_c) * t_c
    sum_exp_t = jnp.sum(exp_t)              # S = sum_c exp(t_c)

    in_itemsize = jnp.dtype(results.dtype).itemsize

    if B <= 8:
        # Single full-extent block (block dim == array dim, alignment-exempt).
        tile_rows = B
    else:
        if tile_rows is None:
            tile_rows = _choose_tile_rows(C, in_itemsize)
        tile_rows = max(8, (tile_rows // 8) * 8)        # (8,128) alignment
        # Guarantee >= 2 grid steps so both v7x TensorCores get work even when
        # the whole batch would fit a single tile (no cost on v5e/v6e).
        half_up = ((-(-B // 2) + 7) // 8) * 8
        tile_rows = min(tile_rows, half_up)

    num_tiles = pl.cdiv(B, tile_rows)

    # Explicit VMEM budget: 2x input buffers + f32 temps + exp_t + outputs,
    # plus margin; floor 32 MiB (raises v5e's 16 MiB default scoped limit),
    # cap 48 MiB (headroom under v7x's 64 MiB physical VMEM).
    est = (2 * tile_rows * C * in_itemsize
           + 3 * tile_rows * C * 4
           + 2 * C * 4
           + 2 * 2 * 8 * 128 * 4)
    vmem_limit = int(min(max(est + 12 * 1024 * 1024, _VMEM_LIMIT_FLOOR),
                         _VMEM_LIMIT_CAP))

    wsum_parts, lse_parts = pl.pallas_call(
        functools.partial(_kldiv_partial_kernel, batch_size=B),
        out_shape=(
            jax.ShapeDtypeStruct((num_tiles, 8, 128), jnp.float32),
            jax.ShapeDtypeStruct((num_tiles, 8, 128), jnp.float32),
        ),
        grid=(num_tiles,),
        in_specs=[
            # Pipelined logits tiles over the batch axis (double-buffered).
            pl.BlockSpec((tile_rows, C), lambda i: (i, 0)),
            # exp(targets): same block every step -> DMA'd once, stays resident.
            pl.BlockSpec((1, C), lambda i: (0, 0)),
        ],
        out_specs=[
            pl.BlockSpec((1, 8, 128), lambda i: (i, 0, 0)),
            pl.BlockSpec((1, 8, 128), lambda i: (i, 0, 0)),
        ],
        compiler_params=pltpu.CompilerParams(
            # Independent per-tile partials -> batch-tile axis shardable
            # across TensorCores (2 TCs on v7x); harmless on v5e/v6e.
            dimension_semantics=("parallel",),
            vmem_limit_bytes=vmem_limit,
        ),
    )(results, exp_t)

    # loss = sum_{b,c} exp(t_c) * (t_c - log_p[b,c]) / B
    #      = const_term - (sum_b wsum_b - S * sum_b lse_b) / B
    sum_wsum = jnp.sum(wsum_parts[:, 0, 0])
    sum_lse = jnp.sum(lse_parts[:, 0, 0])
    return const_term - (sum_wsum - sum_exp_t * sum_lse) / jnp.float32(B)


if __name__ == "__main__":
    key = jax.random.PRNGKey(0)
    k1, k2, k3 = jax.random.split(key, 3)

    # Small shapes consistent with the module: (batch_size, num_classes) logits
    # and (num_classes,) log-probability targets.
    B, C = 4, 16
    results = jax.random.normal(k1, (B, C), dtype=jnp.float32)
    targets = jax.nn.log_softmax(
        jax.random.normal(k2, (C,), dtype=jnp.float32), axis=-1
    )

    loss = kldiv_loss(results, targets)
    jax.block_until_ready(loss)

    # Pure-JAX reference (same math as nn.KLDivLoss(batchmean, log_target=True)).
    def ref_loss(x, t):
        log_p = jax.nn.log_softmax(x, axis=1)
        tb = jnp.broadcast_to(t, x.shape)
        return jnp.sum(jnp.exp(tb) * (tb - log_p)) / x.shape[0]

    ref = ref_loss(results, targets)
    assert jnp.allclose(loss, ref, rtol=1e-5, atol=1e-5), (loss, ref)

    # Exercise the tiled multi-block path with a ragged last tile.
    B2 = 20
    results2 = jax.random.normal(k3, (B2, C), dtype=jnp.float32)
    loss2 = kldiv_loss(results2, targets, tile_rows=8)
    jax.block_until_ready(loss2)
    ref2 = ref_loss(results2, targets)
    assert jnp.allclose(loss2, ref2, rtol=1e-5, atol=1e-5), (loss2, ref2)

    # Exercise the auto-tiled path (forces >=2 grid steps) and bf16 input.
    B3 = 24
    results3 = jax.random.normal(k3, (B3, C), dtype=jnp.float32)
    loss3 = kldiv_loss(results3.astype(jnp.bfloat16), targets)
    jax.block_until_ready(loss3)
    ref3 = ref_loss(results3.astype(jnp.bfloat16).astype(jnp.float32), targets)
    assert jnp.allclose(loss3, ref3, rtol=1e-3, atol=1e-3), (loss3, ref3)

    print("KERNEL_OK")
</pallas_src>

<mosaic_0001>
module attributes {stable_mosaic.version = 11 : i64} {
  func.func @_kldiv_partial_kernel(%arg0: i32, %arg1: memref<4x16xf32, #tpu.memory_space<vmem>>, %arg2: memref<1x16xf32, #tpu.memory_space<vmem>>, %arg3: memref<1x8x128xf32, #tpu.memory_space<vmem>>, %arg4: memref<1x8x128xf32, #tpu.memory_space<vmem>>) attributes {dimension_semantics = [#tpu.dimension_semantics<parallel>], iteration_bounds = array<i64: 1>, scalar_prefetch = 0 : i64, scratch_operands = 0 : i64, tpu.core_type = #tpu.core_type<tc>, window_params = [{transform_indices = @transform_0, window_bounds = array<i64: 4, 16>}, {pipeline_mode = #tpu.pipeline_mode<synchronous>, transform_indices = @transform_1, window_bounds = array<i64: 1, 16>}, {transform_indices = @transform_2, window_bounds = array<i64: 1, 8, 128>}, {transform_indices = @transform_3, window_bounds = array<i64: 1, 8, 128>}]} {
    %c0 = arith.constant 0 : index
    %c0_0 = arith.constant 0 : index
    %0 = vector.load %arg1[%c0, %c0_0] : memref<4x16xf32, #tpu.memory_space<vmem>>, vector<4x16xf32>
    %c0_1 = arith.constant 0 : index
    %c0_2 = arith.constant 0 : index
    %1 = vector.load %arg2[%c0_1, %c0_2] : memref<1x16xf32, #tpu.memory_space<vmem>>, vector<1x16xf32>
    %cst = arith.constant dense<0xFF800000> : vector<4xf32>
    %2 = vector.multi_reduction <maximumf>, %0, %cst [1] : vector<4x16xf32> to vector<4xf32>
    %3 = vector.shape_cast %2 : vector<4xf32> to vector<4x1xf32>
    %4 = vector.broadcast %3 : vector<4x1xf32> to vector<4x16xf32>
    %5 = arith.subf %0, %4 : vector<4x16xf32>
    %6 = math.exp %5 : vector<4x16xf32>
    %cst_3 = arith.constant dense<0.000000e+00> : vector<4xf32>
    %7 = vector.multi_reduction <add>, %6, %cst_3 [1] : vector<4x16xf32> to vector<4xf32>
    %8 = vector.shape_cast %7 : vector<4xf32> to vector<4x1xf32>
    %9 = math.log %8 : vector<4x1xf32>
    %10 = arith.addf %9, %3 : vector<4x1xf32>
    %11 = vector.broadcast %1 : vector<1x16xf32> to vector<4x16xf32>
    %12 = arith.mulf %0, %11 : vector<4x16xf32>
    %cst_4 = arith.constant dense<0.000000e+00> : vector<4xf32>
    %13 = vector.multi_reduction <add>, %12, %cst_4 [1] : vector<4x16xf32> to vector<4xf32>
    %14 = vector.shape_cast %13 : vector<4xf32> to vector<4x1xf32>
    %15 = tpu.iota {dimensions = array<i32: 0>} : vector<4x1xi32>
    %c4_i32 = arith.constant 4 : i32
    %16 = arith.muli %arg0, %c4_i32 : i32
    %17 = vector.broadcast %16 : i32 to vector<4x1xi32>
    %18 = arith.addi %15, %17 : vector<4x1xi32>
    %c4_i32_5 = arith.constant 4 : i32
    %19 = vector.broadcast %c4_i32_5 : i32 to vector<4x1xi32>
    %20 = arith.cmpi slt, %18, %19 : vector<4x1xi32>
    %cst_6 = arith.constant 0.000000e+00 : f32
    %21 = vector.broadcast %cst_6 : f32 to vector<4x1xf32>
    %22 = arith.select %20, %14, %21 : vector<4x1xi1>, vector<4x1xf32>
    %23 = vector.shape_cast %22 : vector<4x1xf32> to vector<1x4x1xf32>
    %cst_7 = arith.constant dense<0.000000e+00> : vector<1xf32>
    %24 = vector.multi_reduction <add>, %23, %cst_7 [1, 2] : vector<1x4x1xf32> to vector<1xf32>
    %25 = vector.shape_cast %24 : vector<1xf32> to vector<1x1x1xf32>
    %26 = vector.extract %25[0, 0, 0] : f32 from vector<1x1x1xf32>
    %cst_8 = arith.constant 0.000000e+00 : f32
    %27 = vector.broadcast %cst_8 : f32 to vector<4x1xf32>
    %28 = arith.select %20, %10, %27 : vector<4x1xi1>, vector<4x1xf32>
    %29 = vector.shape_cast %28 : vector<4x1xf32> to vector<1x4x1xf32>
    %cst_9 = arith.constant dense<0.000000e+00> : vector<1xf32>
    %30 = vector.multi_reduction <add>, %29, %cst_9 [1, 2] : vector<1x4x1xf32> to vector<1xf32>
    %31 = vector.shape_cast %30 : vector<1xf32> to vector<1x1x1xf32>
    %32 = vector.extract %31[0, 0, 0] : f32 from vector<1x1x1xf32>
    %33 = vector.broadcast %26 : f32 to vector<1x8x128xf32>
    %c0_10 = arith.constant 0 : index
    %c0_11 = arith.constant 0 : index
    %c0_12 = arith.constant 0 : index
    %34 = vector.load %arg3[%c0_10, %c0_11, %c0_12] : memref<1x8x128xf32, #tpu.memory_space<vmem>>, vector<1x8x128xf32>
    tpu.vector_store %arg3[%c0_10, %c0_11, %c0_12], %33 {strides = array<i32>} : memref<1x8x128xf32, #tpu.memory_space<vmem>>, vector<1x8x128xf32>,
    %35 = vector.broadcast %32 : f32 to vector<1x8x128xf32>
    %c0_13 = arith.constant 0 : index
    %c0_14 = arith.constant 0 : index
    %c0_15 = arith.constant 0 : index
    %36 = vector.load %arg4[%c0_13, %c0_14, %c0_15] : memref<1x8x128xf32, #tpu.memory_space<vmem>>, vector<1x8x128xf32>
    tpu.vector_store %arg4[%c0_13, %c0_14, %c0_15], %35 {strides = array<i32>} : memref<1x8x128xf32, #tpu.memory_space<vmem>>, vector<1x8x128xf32>,
    return
  }
  func.func @transform_0(%arg0: i32) -> (i32, i32) {
    %c0_i32 = arith.constant 0 : i32
    %c0_i32_0 = arith.constant 0 : i32
    return %arg0, %c0_i32 : i32, i32
  }
  func.func @transform_1(%arg0: i32) -> (i32, i32) {
    %c0_i32 = arith.constant 0 : i32
    %c0_i32_0 = arith.constant 0 : i32
    %c0_i32_1 = arith.constant 0 : i32
    return %c0_i32, %c0_i32_0 : i32, i32
  }
  func.func @transform_2(%arg0: i32) -> (i32, i32, i32) {
    %c0_i32 = arith.constant 0 : i32
    %c0_i32_0 = arith.constant 0 : i32
    %c0_i32_1 = arith.constant 0 : i32
    return %arg0, %c0_i32, %c0_i32_0 : i32, i32, i32
  }
  func.func @transform_3(%arg0: i32) -> (i32, i32, i32) {
    %c0_i32 = arith.constant 0 : i32
    %c0_i32_0 = arith.constant 0 : i32
    %c0_i32_1 = arith.constant 0 : i32
    return %arg0, %c0_i32, %c0_i32_0 : i32, i32, i32
  }
}

</mosaic_0001>

<bundles_post_ra>
// kernel: tpu_custom_call.1
= control target key start
LH: loop header
LB: loop body
LE: loop exit
PB: predicated region body
PF: predicated region fallthrough
CT: control target
= control target key end

     0   :  { %9 = vsyncpa [#allocation3], 0  ;;  %s260_s0 = inlined_call_operand.hbm [shape: f32[4,16], index: 0, kind: input, shape index: {}]   ;;  %s261_s1 = inlined_call_operand.vmem [shape: f32[1,16], index: 1, kind: input, shape index: {}]   ;;  %s262_s2 = inlined_call_operand.hbm [shape: f32[1,8,128], index: 2, kind: output, shape index: {0}]   ;;  %s263_s3 = inlined_call_operand.hbm [shape: f32[1,8,128], index: 3, kind: output, shape index: {1}]  }
   0x1   :  { %10 = vsyncpa [#allocation4], 0 }
   0x2   :  { %11 = vsyncpa [#allocation7], 0  ;;  %s198_s12 = smov [#allocation2]   ;;  %s126_s16 = scalar_lea.hbm %s260_s0, 64 }
   0x3   :  { %s18_s13 = sshll.u32 %s198_s12, 4  ;;  %p127_p0 = scmp.ne.s32.totalorder %s260_s0, %s126_s16  ;;  %s19_s13 = int_to_ptr.vmem [resolvable:$true] %s18_s13 }
   0x4   :  { %p130_p1 = scmp.lt.u32.totalorder %s126_s16, %s260_s0 }
   0x6   :  { %p132_p2 = pnand %p130_p1, %p127_p0 }
   0x8   :  { %135 = shalt.err (!%p132_p2)
}
   0x9   :  { %s136_s21 = scalar_lea.vmem %s19_s13, 64  ;;  %p141_p4 = scmp.lt.s32.totalorder %s19_s13, %s19_s13 }
   0xa   :  { %p137_p3 = scmp.ne.s32.totalorder %s19_s13, %s136_s21  ;;  %p142_p5 = scmp.lt.s32.totalorder %s136_s21, %s136_s21 }
   0xc   :  { %p143_p6 = por %p142_p5, %p141_p4 }
   0xe   :  { %p144_p7 = pnand %p143_p6, %p137_p3 }
  0x10   :  { %147 = shalt.err (!%p144_p7)
}
  0x11   :  { %21 = dma.hbm_to_vmem [thread:$0]  %s260_s0, 64, %s19_s13, [#allocation3]  }
  0x12   :  { %192 = dma.done.wait [#allocation3], 64  }
  0x13   :  { %193 = vsyncadd [#allocation3], 4294967232  ;;  %vm29_vm0 = vcmask 125952   ;;  %v27_v0 = vld [vmem:[#allocation2] sm:$0xf]  ;;  %v52_v10 = vlaneseq  ;;  %vm59_vm2 = vcmask 3072  }
  0x14   :  { %v30_v1 = vsel %vm29_vm0, %v27_v0, -inf  ;;  %v114_v2 = vld [vmem:[%s261_s1] ss:$0 sm:$0xff]  ;;  %s199_s1 = smov [#allocation5]  }
  0x15   :  { %31 = vmax.xlane.f32.xlu0 %v30_v1  ;;  %v48_v3 = vmul.f32 %v114_v2, %v27_v0  ;;  %v53_v11 = vshrl.u32 %v52_v10, 7  ;;  %s91_s26 = sshll.u32 %s199_s1, 4  ;;  %s92_s26 = int_to_ptr.vmem [resolvable:$true] %s91_s26 }
  0x16   :  { %s148_s27 = scalar_lea.vmem %s92_s26, 128  ;;  %p153_p9 = scmp.lt.s32.totalorder %s92_s26, %s92_s26 }
  0x17   :  { %v49_v4 = vsel %vm29_vm0, %v48_v3, 0.0  ;;  %vm57_vm1 = vcmp.lt.s32.totalorder %v53_v11, 4  ;;  %p149_p8 = scmp.ne.s32.totalorder %s92_s26, %s148_s27  ;;  %p154_p10 = scmp.lt.s32.totalorder %s148_s27, %s148_s27 }
  0x18   :  { %50 = vadd.xlane.f32.xlu1 %v49_v4 }
  0x19   :  { %p155_p11 = por %p154_p10, %p153_p9 }
  0x1b   :  { %p156_p12 = pnand %p155_p11, %p149_p8 }
  0xa2   :  { %v32_v5 = vpop.xlane.xlu0 %31 }
  0xa3   :  { %v33_v6 = vsub.f32 %v27_v0, %v32_v5 }
  0xa5   :  { %v34_v7 = vmul.f32 1.442695, %v33_v6  ;;  %v51_v12 = vpop.xlane.xlu1 %50 }
  0xa6   :  { %v58_v13 = vsel %vm57_vm1, %v51_v12, 0.0 }
  0xa7   :  { %122 = vpow2.f32 %v34_v7  ;;  %v60_v14 = vsel %vm59_vm2, %v58_v13, 0.0 }
  0xa8   :  { %61 = vadd.xlane.f32.xlu1 %v60_v14 }
  0xb1   :  { %v123_v8 = vpop.eup %122 }
  0xb2   :  { %v36_v9 = vsel %vm29_vm0, %v123_v8, 0.0 }
  0xb3   :  { %37 = vadd.xlane.f32.xlu0 %v36_v9 }
 0x135   :  { %v62_v21 = vpop.xlane.xlu1 %61 }
 0x136   :  { %v63_v22 = vrot.slane %v62_v21, 4 }
 0x138   :  { %v64_v23 = vadd.f32 %v63_v22, %v62_v21 }
 0x13a   :  { %v65_v24 = vrot.slane %v64_v23, 2 }
 0x13c   :  { %v66_v25 = vadd.f32 %v65_v24, %v64_v23 }
 0x13e   :  { %v67_v26 = vrot.slane %v66_v25, 1 }
 0x140   :  { %v38_v15 = vpop.xlane.xlu0 %37  ;;  %v68_v27 = vadd.f32 %v67_v26, %v66_v25 }
 0x141   :  { %124 = vlog2.f32 %v38_v15 }
 0x142   :  { %115 = vpush %v68_v27 }
 0x14b   :  { %v125_v16 = vpop.eup %124 }
 0x14c   :  { %v40_v17 = vmul.f32 0.6931472, %v125_v16 }
 0x14e   :  { %v41_v18 = vadd.f32 %v40_v17, %v32_v5 }
 0x150   :  { %v70_v19 = vsel %vm57_vm1, %v41_v18, 0.0 }
 0x151   :  { %v71_v20 = vsel %vm59_vm2, %v70_v19, 0.0 }
 0x152   :  { %72 = vadd.xlane.f32.xlu0 %v71_v20 }
 0x173   :  { %s116_s0 = spop %115 }
 0x174   :  { %v81_v28 = vstv %s116_s0 }
 0x175   :  { %82 = vst [vmem:[#allocation5] sm:$0xff] %v81_v28 }
 0x176   :  { %159 = shalt.err (!%p156_p12)
}
 0x177   :  { %s160_s30 = scalar_lea.hbm %s262_s2, 128 }
 0x178   :  { %p161_p13 = scmp.ne.s32.totalorder %s262_s2, %s160_s30  ;;  %p164_p0 = scmp.lt.u32.totalorder %s160_s30, %s262_s2 }
 0x17a   :  { %p166_p1 = pnand %p164_p0, %p161_p13 }
 0x17c   :  { %169 = shalt.err (!%p166_p1)
}
 0x17d   :  { %94 = dma.vmem_to_hbm [thread:$0]  %s92_s26, 128, %s262_s2, [#allocation4]  }
 0x17e   :  { %s200_s10 = smov [#allocation6]  }
 0x17f   :  { %s101_s11 = sshll.u32 %s200_s10, 4  ;;  %s102_s11 = int_to_ptr.vmem [resolvable:$true] %s101_s11 }
 0x180   :  { %s170_s13 = scalar_lea.vmem %s102_s11, 128  ;;  %p175_p3 = scmp.lt.s32.totalorder %s102_s11, %s102_s11 }
 0x181   :  { %p171_p2 = scmp.ne.s32.totalorder %s102_s11, %s170_s13  ;;  %p176_p4 = scmp.lt.s32.totalorder %s170_s13, %s170_s13 }
 0x183   :  { %p177_p5 = por %p176_p4, %p175_p3 }
 0x185   :  { %p178_p6 = pnand %p177_p5, %p171_p2 }
 0x1df   :  { %v73_v29 = vpop.xlane.xlu0 %72 }
 0x1e0   :  { %v74_v30 = vrot.slane %v73_v29, 4 }
 0x1e2   :  { %v75_v31 = vadd.f32 %v74_v30, %v73_v29 }
 0x1e4   :  { %v76_v32 = vrot.slane %v75_v31, 2 }
 0x1e6   :  { %v77_v33 = vadd.f32 %v76_v32, %v75_v31 }
 0x1e8   :  { %v78_v34 = vrot.slane %v77_v33, 1 }
 0x1ea   :  { %v79_v35 = vadd.f32 %v78_v34, %v77_v33 }
 0x1ec   :  { %117 = vpush %v79_v35 }
 0x21d   :  { %s118_s12 = spop %117 }
 0x21e   :  { %v83_v36 = vstv %s118_s12 }
 0x21f   :  { %84 = vst [vmem:[#allocation6] sm:$0xff] %v83_v36 }
 0x220   :  { %181 = shalt.err (!%p178_p6)
}
 0x221   :  { %s182_s15 = scalar_lea.hbm %s263_s3, 128 }
 0x222   :  { %p183_p7 = scmp.ne.s32.totalorder %s263_s3, %s182_s15  ;;  %p186_p8 = scmp.lt.u32.totalorder %s182_s15, %s263_s3 }
 0x224   :  { %p188_p9 = pnand %p186_p8, %p183_p7 }
 0x226   :  { %191 = shalt.err (!%p188_p9)
}
 0x227   :  { %104 = dma.vmem_to_hbm [thread:$0]  %s102_s11, 128, %s263_s3, [#allocation7]  }
 0x228   :  { %194 = dma.done.wait [#allocation4], 128  }
 0x229   :  { %195 = vsyncadd [#allocation4], 4294967168 }
 0x22a   :  { %196 = dma.done.wait [#allocation7], 128  }
 0x22b   :  { %197 = vsyncadd [#allocation7], 4294967168 }
 0x22c   :  { %111 = vsyncpa [#allocation3], 1 }
 0x22d   :  { %112 = vsyncpa [#allocation4], 1 }
 0x22e   :  { %113 = vsyncpa [#allocation7], 1 }

</bundles_post_ra>
